<compile_context>
chip_gen: v7x
topology: tpu7x:2x2x1
jax: 0.10.0
libtpu: 0.0.40
codegen_flags: <defaults>
</compile_context>

<pallas_src>
import jax
import jax.numpy as jnp
from jax.experimental import pallas as pl
from jax.experimental.pallas import tpu as pltpu

_LANES = 128
_SUBLANES = 8
_MAX_TILE_ROWS = 1024  # 1024*128*4B = 512 KiB per buffer; safe on v5e/v6e/v7x.


def _sin_kernel(x_ref, o_ref):
    """Elementwise sin on one VMEM tile.

    Compute in float32 (EUP transcendental path), downcast on store so the
    output buffer stays in the caller's dtype.
    """
    x = x_ref[...].astype(jnp.float32)
    o_ref[...] = jnp.sin(x).astype(o_ref.dtype)


def _round_up(n, m):
    return ((n + m - 1) // m) * m


def sin_forward(x):
    """Apply sin elementwise to x (any shape/dtype) via a Pallas TPU kernel."""
    orig_shape = x.shape
    orig_dtype = x.dtype

    total = x.size
    rows = pl.cdiv(total, _LANES)

    # Tile selection: one block for small inputs, capped large tiles otherwise.
    if rows <= _MAX_TILE_ROWS:
        tile_rows = max(_round_up(rows, _SUBLANES), _SUBLANES)
    else:
        tile_rows = _MAX_TILE_ROWS

    rows_padded = _round_up(max(rows, 1), tile_rows)
    grid = rows_padded // tile_rows

    # Pad the flat array to a whole number of full tiles (values in the pad
    # region are computed but discarded).
    flat = x.reshape(-1)
    pad = rows_padded * _LANES - total
    if pad:
        flat = jnp.pad(flat, (0, pad))
    x2d = flat.reshape(rows_padded, _LANES)

    out2d = pl.pallas_call(
        _sin_kernel,
        out_shape=jax.ShapeDtypeStruct((rows_padded, _LANES), orig_dtype),
        grid_spec=pltpu.PrefetchScalarGridSpec(
            num_scalar_prefetch=0,
            grid=(grid,),
            in_specs=[pl.BlockSpec((tile_rows, _LANES), lambda i: (i, 0))],
            out_specs=pl.BlockSpec((tile_rows, _LANES), lambda i: (i, 0)),
        ),
        compiler_params=pltpu.CompilerParams(
            dimension_semantics=("parallel",),
            vmem_limit_bytes=32 * 1024 * 1024,
        ),
    )(x2d)

    out = out2d.reshape(-1)
    if pad:
        out = out[:total]
    return out.reshape(orig_shape)


def sin_reference(x):
    """Pure-JAX reference mirroring the PyTorch forward: torch.sin(x)."""
    return jnp.sin(x)


if __name__ == "__main__":
    key = jax.random.PRNGKey(0)
    x = jax.random.normal(key, (2, 4, 16, 16), dtype=jnp.float32)  # NCHW

    out = sin_forward(x)
    out = jax.block_until_ready(out)

    ref = sin_reference(x)
    assert out.shape == x.shape and out.dtype == x.dtype
    assert jnp.allclose(out, ref, rtol=1e-6, atol=1e-6)

    print("KERNEL_OK")
</pallas_src>

<mosaic_0001>
module attributes {stable_mosaic.version = 11 : i64} {
  func.func @_sin_kernel(%arg0: i32, %arg1: memref<16x128xf32, #tpu.memory_space<vmem>>, %arg2: memref<16x128xf32, #tpu.memory_space<vmem>>) attributes {dimension_semantics = [#tpu.dimension_semantics<parallel>], iteration_bounds = array<i64: 1>, scalar_prefetch = 0 : i64, scratch_operands = 0 : i64, tpu.core_type = #tpu.core_type<tc>, window_params = [{transform_indices = @transform_0, window_bounds = array<i64: 16, 128>}, {transform_indices = @transform_1, window_bounds = array<i64: 16, 128>}]} {
    %c0 = arith.constant 0 : index
    %c0_0 = arith.constant 0 : index
    %0 = vector.load %arg1[%c0, %c0_0] : memref<16x128xf32, #tpu.memory_space<vmem>>, vector<16x128xf32>
    %1 = math.sin %0 : vector<16x128xf32>
    %c0_1 = arith.constant 0 : index
    %c0_2 = arith.constant 0 : index
    %2 = vector.load %arg2[%c0_1, %c0_2] : memref<16x128xf32, #tpu.memory_space<vmem>>, vector<16x128xf32>
    tpu.vector_store %arg2[%c0_1, %c0_2], %1 {strides = array<i32>} : memref<16x128xf32, #tpu.memory_space<vmem>>, vector<16x128xf32>,
    return
  }
  func.func @transform_0(%arg0: i32) -> (i32, i32) {
    %c0_i32 = arith.constant 0 : i32
    %c0_i32_0 = arith.constant 0 : i32
    return %arg0, %c0_i32 : i32, i32
  }
  func.func @transform_1(%arg0: i32) -> (i32, i32) {
    %c0_i32 = arith.constant 0 : i32
    %c0_i32_0 = arith.constant 0 : i32
    return %arg0, %c0_i32 : i32, i32
  }
}

</mosaic_0001>

<bundles_post_ra>
// kernel: tpu_custom_call.1
= control target key start
LH: loop header
LB: loop body
LE: loop exit
PB: predicated region body
PF: predicated region fallthrough
CT: control target
= control target key end

     0   :  { %6 = vsyncpa [#allocation3], 0  ;;  %s454_s0 = inlined_call_operand.hbm [shape: f32[16,128], index: 0, kind: input, shape index: {}]   ;;  %s455_s1 = inlined_call_operand.hbm [shape: f32[16,128], index: 1, kind: output, shape index: {}]  }
   0x1   :  { %7 = vsyncpa [#allocation4], 0  ;;  %s334_s6 = smov [#allocation2]   ;;  %s286_s10 = scalar_lea.hbm %s454_s0, 256 }
   0x2   :  { %s13_s7 = sshll.u32 %s334_s6, 4  ;;  %p287_p0 = scmp.ne.s32.totalorder %s454_s0, %s286_s10  ;;  %s14_s7 = int_to_ptr.vmem [resolvable:$true] %s13_s7 }
   0x3   :  { %p290_p1 = scmp.lt.u32.totalorder %s286_s10, %s454_s0 }
   0x5   :  { %p292_p2 = pnand %p290_p1, %p287_p0 }
   0x7   :  { %295 = shalt.err (!%p292_p2)
}
   0x8   :  { %s296_s15 = scalar_lea.vmem %s14_s7, 256  ;;  %p301_p4 = scmp.lt.s32.totalorder %s14_s7, %s14_s7 }
   0x9   :  { %p297_p3 = scmp.ne.s32.totalorder %s14_s7, %s296_s15  ;;  %p302_p5 = scmp.lt.s32.totalorder %s296_s15, %s296_s15 }
   0xb   :  { %p303_p6 = por %p302_p5, %p301_p4 }
   0xd   :  { %p304_p7 = pnand %p303_p6, %p297_p3 }
   0xf   :  { %307 = shalt.err (!%p304_p7)
}
  0x10   :  { %s335_s16 = smov 128   ;;  %s336_s17 = smov 8  }
  0x11   :  { %19 = dma.hbm_to_vmem [thread:$0]  %s454_s0, 256, %s14_s7, [#allocation3], %s335_s16, %s335_s16, %s336_s17  }
  0x12   :  { %330 = dma.done.wait [#allocation3], 256  }
  0x13   :  { %331 = vsyncadd [#allocation3], 4294967040  ;;  %v369_v0 = vld [vmem:[#allocation2] sm:$0xff]  ;;  %v371_v1 = vld [vmem:[#allocation2 + $0x8] sm:$0xff]  ;;  %v337_v24 = vmov 683565275  }
  0x14   :  { %v25_v2 = vand.u32 2147483647, %v369_v0  ;;  %v28_v3 = vand.u32 2139095040, %v369_v0  ;;  %v129_v4 = vand.u32 2147483647, %v371_v1  ;;  %v132_v5 = vand.u32 2139095040, %v371_v1 }
  0x15   :  { %v338_v26 = vmov 2475754826   ;;  %v339_v28 = vmov 2131351028   ;;  %v340_v30 = vmov 2102212464  }
  0x16   :  { %v29_v6 = vshrl.u32 %v28_v3, 23  ;;  %v32_v7 = vand.u32 8388607, %v25_v2  ;;  %v133_v8 = vshrl.u32 %v132_v5, 23  ;;  %v136_v9 = vand.u32 8388607, %v129_v4 }
  0x17   :  { %v341_v32 = vmov 920167782   ;;  %v342_v40 = vmov 1326507024   ;;  %vm27_vm14 = vcmp.lt.s32.totalorder %v369_v0, 0  ;;  %s343_s0 = smov [#allocation5]  }
  0x18   :  { %v252_v10 = vadd.s32 4294967169, %v29_v6  ;;  %v256_v11 = vadd.s32 4294967169, %v133_v8  ;;  %v33_v13 = vor.u32 8388608, %v32_v7  ;;  %v137_v14 = vor.u32 8388608, %v136_v9  ;;  %s240_s20 = sshll.u32 %s343_s0, 4  ;;  %s241_s20 = int_to_ptr.vmem [resolvable:$true] %s240_s20 }
  0x19   :  { %vm26_vm15 = vcmp.le.f32.partialorder %v25_v2, 0.7853982  ;;  %s308_s21 = scalar_lea.vmem %s241_s20, 256  ;;  %p313_p9 = scmp.lt.s32.totalorder %s241_s20, %s241_s20 }
  0x1a   :  { %v35_v12 = vadd.s32 1, %v252_v10  ;;  %v139_v15 = vadd.s32 1, %v256_v11  ;;  %v381_v20 = vshll.u32 %v33_v13, 8  ;;  %v383_v22 = vshll.u32 %v137_v14, 8  ;;  %p309_p8 = scmp.ne.s32.totalorder %s241_s20, %s308_s21  ;;  %p314_p10 = scmp.lt.s32.totalorder %s308_s21, %s308_s21 }
  0x1c   :  { %vm36_vm0 = vcmp.gt.s32.totalorder %v35_v12, 0  ;;  %vm140_vm1 = vcmp.gt.s32.totalorder %v139_v15, 0  ;;  %p315_p11 = por %p314_p10, %p313_p9 }
  0x1d   :  { %v37_v16 = vsel %vm36_vm0, %v35_v12, 0  ;;  %v141_v19 = vsel %vm140_vm1, %v139_v15, 0  ;;  %vm131_vm0 = vcmp.lt.s32.totalorder %v371_v1, 0  ;;  %vm130_vm1 = vcmp.le.f32.partialorder %v129_v4, 0.7853982 }
  0x1e   :  { %v38_v17 = vshrl.u32 %v37_v16, 5  ;;  %v39_v18 = vand.u32 31, %v37_v16  ;;  %v143_v21 = vand.u32 31, %v141_v19  ;;  %v385_v34 = vshrl.u32 %v141_v19, 5  ;;  %p316_p12 = pnand %p315_p11, %p309_p8 }
  0x20   :  { %v40_v23 = vsub.s32 32, %v39_v18  ;;  %v42_v25 = vshll.u32 %v337_v24, %v39_v18  ;;  %v45_v27 = vshll.u32 %v338_v26, %v39_v18  ;;  %v48_v29 = vshll.u32 %v339_v28, %v39_v18 }
  0x21   :  { %v51_v31 = vshll.u32 %v340_v30, %v39_v18  ;;  %v54_v33 = vshll.u32 %v341_v32, %v39_v18  ;;  %vm57_vm2 = vcmp.lt.s32.totalorder %v38_v17, 1  ;;  %vm58_vm3 = vcmp.lt.s32.totalorder %v38_v17, 2 }
  0x22   :  { %v41_v35 = vshrl.u32 %v337_v24, %v40_v23  ;;  %v43_v36 = vshrl.u32 %v338_v26, %v40_v23  ;;  %v46_v37 = vshrl.u32 %v339_v28, %v40_v23  ;;  %v49_v38 = vshrl.u32 %v340_v30, %v40_v23 }
  0x23   :  { %v52_v39 = vshrl.u32 %v341_v32, %v40_v23  ;;  %v55_v41 = vshrl.u32 %v342_v40, %v40_v23  ;;  %vm60_vm4 = vcmp.lt.s32.totalorder %v38_v17, 4  ;;  %v144_v45 = vsub.s32 32, %v143_v21 }
  0x24   :  { %v44_v42 = vor.u32 %v43_v36, %v42_v25  ;;  %v47_v43 = vor.u32 %v46_v37, %v45_v27  ;;  %v50_v44 = vor.u32 %v49_v38, %v48_v29  ;;  %vm59_vm5 = vcmp.lt.s32.totalorder %v38_v17, 3 }
  0x25   :  { %v53_v46 = vor.u32 %v52_v39, %v51_v31  ;;  %v56_v47 = vor.u32 %v55_v41, %v54_v33  ;;  %v146_v48 = vshll.u32 %v337_v24, %v143_v21  ;;  %v149_v56 = vshll.u32 %v338_v26, %v143_v21 }
  0x26   :  { %v61_v49 = vsel %vm57_vm2, %v41_v35, %v44_v42  ;;  %v62_v50 = vsel %vm60_vm4, %v50_v44, 2102212464  ;;  %v65_v51 = vsel %vm57_vm2, %v44_v42, %v47_v43  ;;  %v69_v52 = vsel %vm57_vm2, %v47_v43, %v50_v44 }
  0x27   :  { %v63_v53 = vsel %vm59_vm5, %v47_v43, %v62_v50  ;;  %v66_v54 = vsel %vm60_vm4, %v53_v46, 920167782  ;;  %v70_v55 = vsel %vm60_vm4, %v56_v47, 1326507024  ;;  %v145_v59 = vshrl.u32 %v337_v24, %v144_v45 }
  0x28   :  { %v67_v57 = vsel %vm59_vm5, %v50_v44, %v66_v54  ;;  %v71_v58 = vsel %vm59_vm5, %v53_v46, %v70_v55  ;;  %v147_v60 = vshrl.u32 %v338_v26, %v144_v45  ;;  %v64_v61 = vsel %vm58_vm3, %v61_v49, %v63_v53 }
  0x29   :  { %v68_v62 = vsel %vm58_vm3, %v65_v51, %v67_v57  ;;  %v72_v63 = vsel %vm58_vm3, %v69_v52, %v71_v58  ;;  %v150_v3 = vshrl.u32 %v339_v28, %v144_v45  ;;  %v152_v11 = vshll.u32 %v339_v28, %v143_v21 }
  0x2a   :  { %v394_v5 = vmul.u32.u64.low %v381_v20, %v72_v63  ;;  %v395_v6 = vmul.u32.u64.high %v381_v20, %v72_v63, %v394_v5  ;;  %v398_v7 = vmul.u32.u64.low %v381_v20, %v68_v62  ;;  %v399_v8 = vmul.u32.u64.high %v381_v20, %v68_v62, %v398_v7 }
  0x2b   :  { %v148_v9 = vor.u32 %v147_v60, %v146_v48  ;;  %v151_v10 = vor.u32 %v150_v3, %v149_v56  ;;  %v153_v12 = vshrl.u32 %v340_v30, %v144_v45  ;;  %v155_v13 = vshll.u32 %v340_v30, %v143_v21 }
  0x2c   :  { %v156_v14 = vshrl.u32 %v341_v32, %v144_v45  ;;  %v158_v15 = vshll.u32 %v341_v32, %v143_v21  ;;  %v159_v16 = vshrl.u32 %v342_v40, %v144_v45  ;;  %v80_v17 = vmul.u32 %v381_v20, %v64_v61 }
  0x2d   :  { %v154_v18 = vor.u32 %v153_v12, %v152_v11  ;;  %vm161_vm6 = vcmp.lt.s32.totalorder %v385_v34, 1  ;;  %vm162_vm7 = vcmp.lt.s32.totalorder %v385_v34, 2  ;;  %vm82_vm8 = vc.u32 %v395_v6, %v398_v7 }
  0x2e   :  { %v83_v19 = vadd.s32 1, %v399_v8  ;;  %v157_v23 = vor.u32 %v156_v14, %v155_v13  ;;  %vm163_vm9 = vcmp.lt.s32.totalorder %v385_v34, 3  ;;  %v160_v24 = vor.u32 %v159_v16, %v158_v15 }
  0x2f   :  { %vm164_vm10 = vcmp.lt.s32.totalorder %v385_v34, 4  ;;  %v165_v25 = vsel %vm161_vm6, %v145_v59, %v148_v9  ;;  %v169_v21 = vsel %vm161_vm6, %v148_v9, %v151_v10  ;;  %v173_v28 = vsel %vm161_vm6, %v151_v10, %v154_v18 }
  0x30   :  { %v84_v26 = vsel %vm82_vm8, %v83_v19, %v399_v8  ;;  %v166_v20 = vsel %vm164_vm10, %v154_v18, 2102212464  ;;  %v170_v27 = vsel %vm164_vm10, %v157_v23, 920167782  ;;  %v174_v32 = vsel %vm164_vm10, %v160_v24, 1326507024 }
  0x31   :  { %v85_v29 = vadd.s32 %v84_v26, %v80_v17  ;;  %v167_v30 = vsel %vm163_vm9, %v151_v10, %v166_v20  ;;  %v171_v31 = vsel %vm163_vm9, %v154_v18, %v170_v27  ;;  %v175_v36 = vsel %vm163_vm9, %v157_v23, %v174_v32 }
  0x32   :  { %v168_v33 = vsel %vm162_vm7, %v165_v25, %v167_v30  ;;  %v172_v35 = vsel %vm162_vm7, %v169_v21, %v171_v31  ;;  %v176_v38 = vsel %vm162_vm7, %v173_v28, %v175_v36  ;;  %v81_v57 = vadd.s32 %v398_v7, %v395_v6 }
  0x33   :  { %v86_v37 = vadd.s32 536870912, %v85_v29  ;;  %v416_v39 = vmul.u32.u64.low %v383_v22, %v172_v35  ;;  %v417_v40 = vmul.u32.u64.high %v383_v22, %v172_v35, %v416_v39  ;;  %v184_v44 = vmul.u32 %v383_v22, %v168_v33 }
  0x34   :  { %v420_v41 = vmul.u32.u64.low %v383_v22, %v176_v38  ;;  %v421_v42 = vmul.u32.u64.high %v383_v22, %v176_v38, %v420_v41  ;;  %vm117_vm5 = vweird.f32 %v369_v0  ;;  %vm221_vm9 = vweird.f32 %v371_v1 }
  0x35   :  { %v87_v43 = vshrl.u32 %v86_v37, 30  ;;  %v187_v46 = vadd.s32 1, %v417_v40 }
  0x36   :  { %vm186_vm11 = vc.u32 %v421_v42, %v416_v39  ;;  %v185_v13 = vadd.s32 %v416_v39, %v421_v42 }
  0x37   :  { %v88_v45 = vshll.u32 %v87_v43, 30  ;;  %v188_v34 = vsel %vm186_vm11, %v187_v46, %v417_v40  ;;  %v111_v6 = vsub.s32 4, %v87_v43 }
  0x38   :  { %v189_v48 = vadd.s32 %v188_v34, %v184_v44 }
  0x39   :  { %v89_v47 = vsub.s32 %v85_v29, %v88_v45  ;;  %v112_v25 = vsel %vm27_vm14, %v111_v6, %v87_v43 }
  0x3a   :  { %v190_v50 = vadd.s32 536870912, %v189_v48  ;;  %v114_v28 = vsel %vm26_vm15, 0, %v112_v25 }
  0x3b   :  { %v91_v49 = vsub.s32 0, %v89_v47  ;;  %v118_v33 = vadd.s32 3, %v114_v28 }
  0x3c   :  { %v191_v52 = vshrl.u32 %v190_v50, 30 }
  0x3d   :  { %v253_v51 = vmin.u32 %v91_v49, %v89_v47  ;;  %v119_v37 = vand.u32 3, %v118_v33 }
  0x3e   :  { %v192_v54 = vshll.u32 %v191_v52, 30  ;;  %v215_v32 = vsub.s32 4, %v191_v52 }
  0x3f   :  { %v93_v53 = vclz %v253_v51  ;;  %vm124_vm2 = vcmp.eq.s32.totalorder %v119_v37, 2  ;;  %vm121_vm3 = vcmp.eq.s32.totalorder %v119_v37, 0  ;;  %vm120_vm4 = vcmp.lt.s32.totalorder %v119_v37, 2 }
  0x40   :  { %v193_v56 = vsub.s32 %v189_v48, %v192_v54  ;;  %v216_v36 = vsel %vm131_vm0, %v215_v32, %v191_v52 }
  0x41   :  { %v254_v55 = vadd.s32 4294967294, %v93_v53  ;;  %v218_v40 = vsel %vm130_vm1, 0, %v216_v36 }
  0x42   :  { %v195_v58 = vsub.s32 0, %v193_v56  ;;  %v222_v44 = vadd.s32 3, %v218_v40 }
  0x43   :  { %vm255_vm12 = vcmp.lt.s32.totalorder %v254_v55, 0 }
  0x44   :  { %v96_v22 = vsel %vm255_vm12, 0, %v254_v55  ;;  %v257_v62 = vmin.u32 %v195_v58, %v193_v56  ;;  %v223_v34 = vand.u32 3, %v222_v44 }
  0x45   :  { %v97_v59 = vsub.s32 32, %v96_v22  ;;  %v98_v60 = vshll.u32 %v89_v47, %v96_v22  ;;  %v101_v61 = vsub.s32 4294967266, %v96_v22 }
  0x46   :  { %v197_v5 = vclz %v257_v62  ;;  %vm228_vm6 = vcmp.eq.s32.totalorder %v223_v34, 2  ;;  %vm225_vm7 = vcmp.eq.s32.totalorder %v223_v34, 0  ;;  %vm224_vm8 = vcmp.lt.s32.totalorder %v223_v34, 2 }
  0x47   :  { %v99_v63 = vshrl.u32 %v81_v57, %v97_v59  ;;  %v102_v3 = vadd.s32 127, %v101_v61 }
  0x48   :  { %v258_v10 = vadd.s32 4294967294, %v197_v5 }
  0x49   :  { %v100_v8 = vor.u32 %v99_v63, %v98_v60  ;;  %v103_v9 = vshll.u32 %v102_v3, 23 }
  0x4a   :  { %vm259_vm13 = vcmp.lt.s32.totalorder %v258_v10, 0 }
  0x4b   :  { %v104_v11 = vor.u32 4788187, %v103_v9  ;;  %v107_v12 = vcvt.s32.f32 %v100_v8  ;;  %v200_v7 = vsel %vm259_vm13, 0, %v258_v10 }
  0x4c   :  { %v201_v15 = vsub.s32 32, %v200_v7  ;;  %v202_v16 = vshll.u32 %v193_v56, %v200_v7  ;;  %v205_v17 = vsub.s32 4294967266, %v200_v7 }
  0x4d   :  { %v105_v14 = vand.u32 2147483647, %v104_v11 }
  0x4e   :  { %v203_v19 = vshrl.u32 %v185_v13, %v201_v15  ;;  %v206_v23 = vadd.s32 127, %v205_v17 }
  0x4f   :  { %v108_v18 = vmul.f32 %v107_v12, %v105_v14 }
  0x50   :  { %v204_v21 = vor.u32 %v203_v19, %v202_v16  ;;  %v207_v26 = vshll.u32 %v206_v23, 23 }
  0x51   :  { %v109_v24 = vxor.u32 2147483648, %v108_v18 }
  0x52   :  { %v208_v29 = vor.u32 4788187, %v207_v26  ;;  %v211_v30 = vcvt.s32.f32 %v204_v21 }
  0x53   :  { %v110_v20 = vsel %vm27_vm14, %v109_v24, %v108_v18 }
  0x54   :  { %v113_v27 = vsel %vm26_vm15, %v369_v0, %v110_v20  ;;  %v209_v31 = vand.u32 2147483647, %v208_v29 }
  0x55   :  { %278 = vcosq.f32 %v113_v27 }
  0x56   :  { %280 = vsinq.f32 %v113_v27  ;;  %v212_v35 = vmul.f32 %v211_v30, %v209_v31 }
  0x58   :  { %v213_v2 = vxor.u32 2147483648, %v212_v35 }
  0x5a   :  { %v214_v38 = vsel %vm131_vm0, %v213_v2, %v212_v35 }
  0x5b   :  { %v217_v39 = vsel %vm130_vm1, %v371_v1, %v214_v38 }
  0x5c   :  { %282 = vcosq.f32 %v217_v39 }
  0x5d   :  { %284 = vsinq.f32 %v217_v39 }
  0x5f   :  { %v279_v41 = vpop.eup %278 }
  0x60   :  { %v281_v42 = vpop.eup %280  ;;  %v125_v43 = vxor.u32 2147483648, %v279_v41 }
  0x61   :  { %v122_v45 = vxor.u32 2147483648, %v281_v42 }
  0x62   :  { %v126_v4 = vsel %vm124_vm2, %v125_v43, %v281_v42 }
  0x63   :  { %v123_v46 = vsel %vm121_vm3, %v279_v41, %v122_v45 }
  0x64   :  { %v127_v47 = vsel %vm120_vm4, %v123_v46, %v126_v4 }
  0x65   :  { %v128_v48 = vsel %vm117_vm5, nan, %v127_v47 }
  0x66   :  { %233 = vst [vmem:[#allocation5] sm:$0xff] %v128_v48  ;;  %v283_v49 = vpop.eup %282 }
  0x67   :  { %v285_v50 = vpop.eup %284  ;;  %v229_v51 = vxor.u32 2147483648, %v283_v49 }
  0x68   :  { %v226_v52 = vxor.u32 2147483648, %v285_v50 }
  0x69   :  { %v230_v53 = vsel %vm228_vm6, %v229_v51, %v285_v50 }
  0x6a   :  { %v227_v54 = vsel %vm225_vm7, %v283_v49, %v226_v52 }
  0x6b   :  { %v231_v0 = vsel %vm224_vm8, %v227_v54, %v230_v53 }
  0x6c   :  { %v232_v55 = vsel %vm221_vm9, nan, %v231_v0 }
  0x6d   :  { %234 = vst [vmem:[#allocation5 + $0x8] sm:$0xff] %v232_v55 }
  0x6e   :  { %319 = shalt.err (!%p316_p12)
}
  0x6f   :  { %s320_s24 = scalar_lea.hbm %s455_s1, 256 }
  0x70   :  { %p321_p13 = scmp.ne.s32.totalorder %s455_s1, %s320_s24  ;;  %p324_p0 = scmp.lt.u32.totalorder %s320_s24, %s455_s1 }
  0x72   :  { %p326_p1 = pnand %p324_p0, %p321_p13 }
  0x74   :  { %329 = shalt.err (!%p326_p1)
}
  0x75   :  { %246 = dma.vmem_to_hbm [thread:$0]  %s241_s20, 256, %s455_s1, [#allocation4], %s335_s16, %s335_s16, %s336_s17  }
  0x76   :  { %332 = dma.done.wait [#allocation4], 256  }
  0x77   :  { %333 = vsyncadd [#allocation4], 4294967040 }
  0x78   :  { %250 = vsyncpa [#allocation3], 1 }
  0x79   :  { %251 = vsyncpa [#allocation4], 1 }

</bundles_post_ra>
